<compile_context>
chip_gen: v7x
topology: tpu7x:2x2x1
jax: 0.10.0
libtpu: 0.0.40
codegen_flags: <defaults>
</compile_context>

<pallas_src>
import math
import functools

import jax
import jax.numpy as jnp
from jax.experimental import pallas as pl
from jax.experimental.pallas import tpu as pltpu

ALPHA = 0.5
GAMMA = 1.5
BETA = 1.0
LOSS_WEIGHT = 1.0

_LANE = 128


# ------------------------------ helpers --------------------------------------
def _round_up(x, m):
    return -(-x // m) * m


def _native_sublane(dtype):
    # f32 -> 8, bf16/f16 -> 16, int8/fp8 -> 32 (native packed (S,128) tiles).
    return max(8, 32 // jnp.dtype(dtype).itemsize)


def _max_tile_rows():
    """Row cap per tile: 8192 (4 MiB f32/buffer) on v6e/v7x, 4096 elsewhere."""
    try:
        kind = jax.devices()[0].device_kind.lower()
    except Exception:
        return 4096
    if ("v6" in kind) or ("v7" in kind) or ("7x" in kind):
        return 8192
    return 4096


def _pick_tiling(rows, sublane, max_rows):
    """Rows per tile (multiple of native sublane) and grid length."""
    # Aim for ~8 grid steps so the DMA pipeline has depth and both v7x
    # TensorCores are fed; the max_rows cap dominates for large inputs.
    tm = _round_up(pl.cdiv(rows, 8), sublane)
    tm = max(sublane, min(tm, max_rows))
    return tm, pl.cdiv(rows, tm)


def _loss_consts(alpha, gamma, beta, b, loss_weight):
    """All per-element constants folded at trace time (incl. loss_weight)."""
    return dict(
        beta=float(beta),
        inv_beta=1.0 / float(beta),
        b=float(b),
        c_log=float(loss_weight * alpha / b),
        c_lin=float(loss_weight * alpha),
        c_lrg=float(loss_weight * gamma),
        c_add=float(loss_weight * (gamma / b - alpha * beta)),
    )


def _elementwise_loss(pred, tgt, c):
    """Balanced-L1 loss (f32). diff==0 (zero padding) yields exactly 0."""
    if jnp.issubdtype(pred.dtype, jnp.floating):
        # sub/abs/compare in the native dtype (2x VALU throughput for bf16),
        # then a single upcast of diff to f32 for the transcendental chain.
        diff = jnp.abs(pred - tgt).astype(jnp.float32)
    else:
        diff = jnp.abs(pred.astype(jnp.float32) - tgt.astype(jnp.float32))
    bd = c["b"] * diff
    log_arg = bd if c["inv_beta"] == 1.0 else bd * c["inv_beta"]
    small = c["c_log"] * (bd + 1.0) * jnp.log1p(log_arg) - c["c_lin"] * diff
    large = c["c_lrg"] * diff + c["c_add"]
    return jnp.where(diff < c["beta"], small, large)


# --------------------- sum / mean: per-tile partial sums ---------------------
def _partial_sum_kernel(pred_ref, tgt_ref, out_ref, *, consts, tm,
                        valid_rows_last):
    loss = _elementwise_loss(pred_ref[...], tgt_ref[...], consts)

    def store(x):
        # (tm,128) -> (tm//8, 8, 128) keeps the vreg layout, so the axis-0 sum
        # is pure VPU adds of (8,128) vregs; the expensive cross-lane reduce
        # happens once in the wrapper.
        out_ref[...] = jnp.sum(x.reshape(tm // 8, 8, _LANE), axis=0)

    if valid_rows_last is None:
        store(loss)
    else:
        # Ragged last grid block: rows >= valid_rows_last hold unspecified
        # (out-of-bounds) data — zero them before the partial sum.  The mask
        # cost (~2 VPU ops/elem) is paid on the last grid step only.
        last = pl.num_programs(0) - 1

        @pl.when(pl.program_id(0) != last)
        def _():
            store(loss)

        @pl.when(pl.program_id(0) == last)
        def _():
            row = jax.lax.broadcasted_iota(jnp.int32, (tm, 1), 0)
            store(jnp.where(row < valid_rows_last, loss, 0.0))


# ------------------------------ 'none' path ----------------------------------
def _elementwise_kernel(pred_ref, tgt_ref, out_ref, *, consts):
    loss = _elementwise_loss(pred_ref[...], tgt_ref[...], consts)
    out_ref[...] = loss.astype(out_ref.dtype)


# ------------------------------ host wrapper ---------------------------------
def balanced_l1_loss(pred, target, *, alpha=ALPHA, gamma=GAMMA, beta=BETA,
                     reduction="elementwise_mean", loss_weight=LOSS_WEIGHT):
    assert beta > 0
    assert pred.shape == target.shape and pred.size > 0
    b = math.e ** (gamma / alpha) - 1.0

    n = pred.size
    dtype = pred.dtype
    itemsize = jnp.dtype(dtype).itemsize
    sublane = _native_sublane(dtype)

    # Lane-align only: zero copy when n is already a multiple of 128 (common
    # case, incl. the shipped test shape); otherwise a <=127-element pad (plus
    # a minimum of one native-sublane tile for very small inputs).
    padded_n = max(_round_up(n, _LANE), sublane * _LANE)
    rows = padded_n // _LANE

    max_rows = _max_tile_rows()
    tm, grid = _pick_tiling(rows, sublane, max_rows)
    valid_rows_last = rows - (grid - 1) * tm
    mask_last = valid_rows_last if valid_rows_last < tm else None  # static

    def as_rows(x):
        flat = x.reshape(-1)
        pad = padded_n - n
        if pad:
            # TODO(synk): this pad is one extra HBM pass for non-128-aligned
            # n; avoiding it entirely would need a manual-DMA (pl.ANY) path.
            flat = jnp.concatenate([flat, jnp.zeros((pad,), flat.dtype)])
        return flat.reshape(rows, _LANE)

    p2d, t2d = as_rows(pred), as_rows(target)

    in_specs = [pl.BlockSpec((tm, _LANE), lambda i: (i, 0)),
                pl.BlockSpec((tm, _LANE), lambda i: (i, 0))]
    tile_bytes = tm * _LANE * itemsize

    if reduction == "none":
        # loss_weight folded in-kernel: no wrapper-side full-tensor rescale.
        consts = _loss_consts(alpha, gamma, beta, b, loss_weight)
        out_dtype = dtype if jnp.issubdtype(dtype, jnp.floating) else jnp.float32
        out_itemsize = jnp.dtype(out_dtype).itemsize
        vmem_limit = max(2 * 2 * tile_bytes + 2 * tm * _LANE * out_itemsize
                         + (4 << 20), 16 << 20)
        out2d = pl.pallas_call(
            functools.partial(_elementwise_kernel, consts=consts),
            out_shape=jax.ShapeDtypeStruct((rows, _LANE), out_dtype),
            grid_spec=pltpu.PrefetchScalarGridSpec(
                num_scalar_prefetch=0,
                grid=(grid,),
                in_specs=in_specs,
                out_specs=pl.BlockSpec((tm, _LANE), lambda i: (i, 0)),
            ),
            compiler_params=pltpu.CompilerParams(
                dimension_semantics=("parallel",),
                vmem_limit_bytes=int(vmem_limit)),
            cost_estimate=pl.CostEstimate(
                flops=10 * n, transcendentals=n,
                bytes_accessed=2 * itemsize * n + out_itemsize * n),
        )(p2d, t2d)
        flat = out2d.reshape(-1)
        if padded_n != n:
            flat = flat[:n]
        return flat.reshape(pred.shape)

    # 'elementwise_mean' / 'sum': per-tile (8,128) partial sums (VPU-only);
    # loss_weight applied to the reduced scalar (free).
    consts = _loss_consts(alpha, gamma, beta, b, 1.0)
    vmem_limit = max(2 * 2 * tile_bytes + 2 * 8 * _LANE * 4 + (4 << 20),
                     16 << 20)
    partials = pl.pallas_call(
        functools.partial(_partial_sum_kernel, consts=consts, tm=tm,
                          valid_rows_last=mask_last),
        out_shape=jax.ShapeDtypeStruct((8 * grid, _LANE), jnp.float32),
        grid_spec=pltpu.PrefetchScalarGridSpec(
            num_scalar_prefetch=0,
            grid=(grid,),
            in_specs=in_specs,
            out_specs=pl.BlockSpec((8, _LANE), lambda i: (i, 0)),
        ),
        compiler_params=pltpu.CompilerParams(
            dimension_semantics=("parallel",),
            vmem_limit_bytes=int(vmem_limit)),
        cost_estimate=pl.CostEstimate(
            flops=11 * n, transcendentals=n,
            bytes_accessed=2 * itemsize * n + 4 * 8 * _LANE * grid),
    )(p2d, t2d)

    total = jnp.sum(partials)  # tiny final cross-lane reduce (grid*8*128 f32)
    if reduction == "sum":
        return loss_weight * total
    # 'elementwise_mean'
    return loss_weight * (total / jnp.float32(n))


class BalancedL1Loss:
    """JAX/Pallas port of the PyTorch BalancedL1Loss module (no parameters)."""

    def __init__(self, alpha=0.5, gamma=1.5, beta=1.0,
                 reduction="elementwise_mean", loss_weight=1.0):
        self.alpha = alpha
        self.gamma = gamma
        self.beta = beta
        self.reduction = reduction
        self.loss_weight = loss_weight

    def __call__(self, pred, target, weight=None, reduction_override=None,
                 **kwargs):
        assert reduction_override in (None, "none", "elementwise_mean", "sum")
        reduction = reduction_override if reduction_override else self.reduction
        # `weight` is accepted but unused, matching the reference PyTorch
        # forward which also ignores it.
        return balanced_l1_loss(pred, target, alpha=self.alpha,
                                gamma=self.gamma, beta=self.beta,
                                reduction=reduction,
                                loss_weight=self.loss_weight)


# ------------------------------ reference ------------------------------------
def _reference_elementwise(pred, target, alpha=ALPHA, gamma=GAMMA, beta=BETA,
                           loss_weight=LOSS_WEIGHT):
    diff = jnp.abs(pred - target)
    b = math.e ** (gamma / alpha) - 1.0
    loss = jnp.where(diff < beta,
                     alpha / b * (b * diff + 1.0)
                     * jnp.log(b * diff / beta + 1.0) - alpha * diff,
                     gamma * diff + gamma / b - alpha * beta)
    return loss_weight * loss


if __name__ == "__main__":
    key = jax.random.PRNGKey(0)
    k1, k2, k3, k4 = jax.random.split(key, 4)

    # NCHW inputs, same shape for pred and target (n = 2048, 128-aligned).
    pred = jax.random.normal(k1, (2, 4, 16, 16), dtype=jnp.float32)
    target = jax.random.normal(k2, (2, 4, 16, 16), dtype=jnp.float32)

    module = BalancedL1Loss()
    out = jax.block_until_ready(module(pred, target))
    ref = jax.block_until_ready(jnp.mean(_reference_elementwise(pred, target)))
    assert jnp.allclose(out, ref, rtol=1e-5, atol=1e-5), (out, ref)

    # 'sum' and 'none' overrides.
    out_sum = jax.block_until_ready(module(pred, target,
                                           reduction_override="sum"))
    out_none = jax.block_until_ready(module(pred, target,
                                            reduction_override="none"))
    assert out_none.shape == pred.shape
    assert jnp.allclose(out_sum / pred.size, ref, rtol=1e-5, atol=1e-5)
    assert jnp.allclose(out_none, _reference_elementwise(pred, target),
                        rtol=1e-5, atol=1e-5)

    # Non-128-aligned shape: exercises the small lane pad and the in-kernel
    # ragged-last-block mask (sum path) + masked edge writes ('none' path).
    pred_r = jax.random.normal(k3, (2, 3, 15, 15), dtype=jnp.float32)
    target_r = jax.random.normal(k4, (2, 3, 15, 15), dtype=jnp.float32)
    out_r = jax.block_until_ready(module(pred_r, target_r))
    ref_r = jnp.mean(_reference_elementwise(pred_r, target_r))
    assert jnp.allclose(out_r, ref_r, rtol=1e-5, atol=1e-5), (out_r, ref_r)
    out_r_none = jax.block_until_ready(
        module(pred_r, target_r, reduction_override="none"))
    assert jnp.allclose(out_r_none, _reference_elementwise(pred_r, target_r),
                        rtol=1e-5, atol=1e-5)

    print("KERNEL_OK")
</pallas_src>

<mosaic_0001>
module attributes {stable_mosaic.version = 11 : i64} {
  func.func @_partial_sum_kernel(%arg0: i32, %arg1: memref<8x128xf32, #tpu.memory_space<vmem>>, %arg2: memref<8x128xf32, #tpu.memory_space<vmem>>, %arg3: memref<8x128xf32, #tpu.memory_space<vmem>>) attributes {dimension_semantics = [#tpu.dimension_semantics<parallel>], iteration_bounds = array<i64: 2>, scalar_prefetch = 0 : i64, scratch_operands = 0 : i64, tpu.core_type = #tpu.core_type<tc>, window_params = [{transform_indices = @transform_0, window_bounds = array<i64: 8, 128>}, {transform_indices = @transform_1, window_bounds = array<i64: 8, 128>}, {transform_indices = @transform_2, window_bounds = array<i64: 8, 128>}]} {
    %c0 = arith.constant 0 : index
    %c0_0 = arith.constant 0 : index
    %0 = vector.load %arg1[%c0, %c0_0] : memref<8x128xf32, #tpu.memory_space<vmem>>, vector<8x128xf32>
    %c0_1 = arith.constant 0 : index
    %c0_2 = arith.constant 0 : index
    %1 = vector.load %arg2[%c0_1, %c0_2] : memref<8x128xf32, #tpu.memory_space<vmem>>, vector<8x128xf32>
    %2 = arith.subf %0, %1 : vector<8x128xf32>
    %3 = math.absf %2 : vector<8x128xf32>
    %cst = arith.constant 19.085537 : f32
    %4 = vector.broadcast %cst : f32 to vector<8x128xf32>
    %5 = arith.mulf %4, %3 : vector<8x128xf32>
    %cst_3 = arith.constant 1.000000e+00 : f32
    %6 = vector.broadcast %cst_3 : f32 to vector<8x128xf32>
    %7 = arith.addf %5, %6 : vector<8x128xf32>
    %cst_4 = arith.constant 0.0261978488 : f32
    %8 = vector.broadcast %cst_4 : f32 to vector<8x128xf32>
    %9 = arith.mulf %8, %7 : vector<8x128xf32>
    %10 = math.log1p %5 : vector<8x128xf32>
    %11 = arith.mulf %9, %10 : vector<8x128xf32>
    %cst_5 = arith.constant 5.000000e-01 : f32
    %12 = vector.broadcast %cst_5 : f32 to vector<8x128xf32>
    %13 = arith.mulf %12, %3 : vector<8x128xf32>
    %14 = arith.subf %11, %13 : vector<8x128xf32>
    %cst_6 = arith.constant 1.500000e+00 : f32
    %15 = vector.broadcast %cst_6 : f32 to vector<8x128xf32>
    %16 = arith.mulf %15, %3 : vector<8x128xf32>
    %cst_7 = arith.constant -0.421406448 : f32
    %17 = vector.broadcast %cst_7 : f32 to vector<8x128xf32>
    %18 = arith.addf %16, %17 : vector<8x128xf32>
    %cst_8 = arith.constant 1.000000e+00 : f32
    %19 = vector.broadcast %cst_8 : f32 to vector<8x128xf32>
    %20 = arith.cmpf olt, %3, %19 : vector<8x128xf32>
    %21 = arith.select %20, %14, %18 : vector<8x128xi1>, vector<8x128xf32>
    %22 = vector.shape_cast %21 : vector<8x128xf32> to vector<1x8x128xf32>
    %cst_9 = arith.constant dense<0.000000e+00> : vector<8x128xf32>
    %23 = vector.multi_reduction <add>, %22, %cst_9 [0] : vector<1x8x128xf32> to vector<8x128xf32>
    %c0_10 = arith.constant 0 : index
    %c0_11 = arith.constant 0 : index
    %24 = vector.load %arg3[%c0_10, %c0_11] : memref<8x128xf32, #tpu.memory_space<vmem>>, vector<8x128xf32>
    tpu.vector_store %arg3[%c0_10, %c0_11], %23 {strides = array<i32>} : memref<8x128xf32, #tpu.memory_space<vmem>>, vector<8x128xf32>,
    return
  }
  func.func @transform_0(%arg0: i32) -> (i32, i32) {
    %c0_i32 = arith.constant 0 : i32
    %c0_i32_0 = arith.constant 0 : i32
    return %arg0, %c0_i32 : i32, i32
  }
  func.func @transform_1(%arg0: i32) -> (i32, i32) {
    %c0_i32 = arith.constant 0 : i32
    %c0_i32_0 = arith.constant 0 : i32
    return %arg0, %c0_i32 : i32, i32
  }
  func.func @transform_2(%arg0: i32) -> (i32, i32) {
    %c0_i32 = arith.constant 0 : i32
    %c0_i32_0 = arith.constant 0 : i32
    return %arg0, %c0_i32 : i32, i32
  }
}

</mosaic_0001>

<bundles_post_ra>
// kernel: tpu_custom_call.1
= control target key start
LH: loop header
LB: loop body
LE: loop exit
PB: predicated region body
PF: predicated region fallthrough
CT: control target
= control target key end

     0   :  { %7 = vsyncpa [#allocation3], 0  ;;  %s760_s0 = inlined_call_operand.hbm [shape: f32[16,128], index: 0, kind: input, shape index: {}]   ;;  %s761_s1 = inlined_call_operand.hbm [shape: f32[16,128], index: 1, kind: input, shape index: {}]   ;;  %s762_s2 = inlined_call_operand.hbm [shape: f32[16,128], index: 2, kind: output, shape index: {}]  }
   0x1   :  { %9 = vsyncpa [#allocation3 + $0x1], 0 }
   0x2   :  { %10 = vsyncpa [#allocation6], 0 }
   0x3   :  { %12 = vsyncpa [#allocation6 + $0x1], 0 }
   0x4   :  { %13 = vsyncpa [#allocation4], 0 }
   0x5   :  { %15 = vsyncpa [#allocation4 + $0x1], 0  ;;  %s546_s9 = smov 0   ;;  %s548_s10 = smov 0  }
   0x6   :  { %s550_s11 = smov 0   ;;  %s552_s12 = smov 0  }
   0x7 LB: > { %s567_s13 = sadd.s32 4294967295, %s526_s12   ;;  %s328_s14 = sadd.s32 4294967294, %s526_s12   ;;  %s526_s12 = sphi %s552_s12, %s781_s12   ;;  %s522_s11 = sphi %s550_s11, %s780_s11   ;;  %s518_s10 = sphi %s548_s10, %s779_s10   ;;  %s514_s9 = sphi %s546_s9, %s778_s9  }
   0x8   : > { %s571_s15 = sadd.s32 1, %s526_s12   ;;  %s28_s16 = sadd.s32 1, %s522_s11 }
   0x9   : > { %s25_s17 = ssub.s32 %s526_s12, %s571_s15  ;;  %p35_p0 = scmp.ne.s32.totalorder %s522_s11, %s518_s10 }
   0xa   : > { %p26_p1 = scmp.eq.s32.totalorder %s25_s17, 0  ;;  %p36_p2 = scmp.eq.s32.totalorder %s526_s12, 0 }
   0xb   : > { %p41_p3 = scmp.ne.s32.totalorder %s518_s10, %s514_s9  ;;  %p42_p4 = scmp.eq.s32.totalorder %s567_s13, 0 }
   0xc   : > { %s583_s18 = scalar_select %p26_p1, %s522_s11, %s28_s16  }
   0xd   : > { %p585_p5 = por %p36_p2, %p35_p0  ;;  %p589_p6 = por %p42_p4, %p41_p3 }
   0xe   : > { %p91_p7 = scmp.eq.s32.totalorder %s567_s13, 1  ;;  %p97_p8 = scmp.eq.s32.totalorder %s328_s14, 1 }
   0xf   : > { %s766_s20 = scalar_select %p589_p6, 1, 0 }
  0x10   : > { %p360_p10 = scmp.lt.s32.totalorder %s526_s12, 2  ;;  %p596_p11 = por %p91_p7, %p35_p0 }
  0x11   : > { %p600_p12 = por %p97_p8, %p41_p3  ;;  %s605_s23 = sand.u32 1, %s522_s11  }
  0x12   : > { %s767_s21 = scalar_select %p596_p11, 1, 0 }
  0x13   : > { %s768_s22 = scalar_select %p600_p12, 1, 0 }
  0x14   : > { %s332_s24 = sshll.u32 %s526_s12, 7  ;;  %s331_s25 = sshll.u32 %s605_s23, 3 }
  0x15   : > { %s614_s28 = scalar_lea.hbm %s760_s0, %s332_s24  ;;  %s121_s29 = scalar_lea.vmem [#allocation2], %s331_s25 }
  0x16   : > { %s128_s30 = sshll.u32 %s121_s29, 4  ;;  %p620_p13 = pnand %p360_p10, %p585_p5  ;;  %s624_s30 = int_to_ptr.vmem [resolvable:$true] %s128_s30 }
  0x17   : > { %s118_s4 = scalar_lea.sflag [#allocation3], %s605_s23  ;;  %s396_s5 = scalar_lea.hbm %s614_s28, 128 }
  0x18   : > { %p397_p2 = scmp.ne.s32.totalorder %s614_s28, %s396_s5  ;;  %p398_p3 = pneg %p620_p13 }
  0x19   : > { %s401_s8 = scalar_lea.hbm %s760_s0, 256  ;;  %p402_p5 = scmp.lt.u32.totalorder %s614_s28, %s760_s0 }
  0x1a   : > { %p399_p4 = pnand %p398_p3, %p397_p2  ;;  %p403_p8 = scmp.lt.u32.totalorder %s401_s8, %s396_s5 }
  0x1b   : > { %p405_p9 = scmp.lt.u32.totalorder %s396_s5, %s614_s28 }
  0x1c   : > { %p400_p7 = pneg %p399_p4  ;;  %p404_p10 = por %p403_p8, %p402_p5 }
  0x1e   : > { %p406_p0 = por %p405_p9, %p404_p10 }
  0x20   : > { %p407_p1 = pnand %p406_p0, %p400_p7 }
  0x22   : > { %410 = shalt.err (!%p407_p1)
}
  0x23   : > { %s411_s17 = scalar_lea.vmem %s624_s30, 128  ;;  %s528_s19 = smov [#allocation2]  }
  0x24   : > { %p412_p2 = scmp.ne.s32.totalorder %s624_s30, %s411_s17  ;;  %s416_s26 = sshll.u32 %s528_s19, 4  ;;  %s417_s26 = int_to_ptr.vmem [resolvable:$false] %s416_s26 }
  0x25   : > { %s418_s27 = scalar_lea.vmem %s417_s26, 256  ;;  %p419_p11 = scmp.lt.s32.totalorder %s624_s30, %s417_s26 }
  0x26   : > { %p414_p4 = pnand %p412_p2, %p398_p3  ;;  %p420_p5 = scmp.lt.s32.totalorder %s418_s27, %s411_s17 }
  0x28   : > { %p415_p12 = pneg %p414_p4  ;;  %p421_p8 = por %p420_p5, %p419_p11 }
  0x2a   : > { %p422_p9 = pnand %p421_p8, %p415_p12 }
  0x2c   : > { %425 = shalt.err (!%p422_p9)
}
  0x2d   : > { %352 = dma.hbm_to_vmem [thread:$0]  (!%p620_p13), %s614_s28, 128, %s624_s30, %s118_s4  }
  0x2e   : > { %p770_p0 = scmp.lt.s32.totalorder %s526_s12, 3  ;;  %p771_p1 = scmp.ge.s32.totalorder %s526_s12, 1 }
  0x2f   : > { %s667_s7 = scalar_lea.hbm %s761_s1, %s332_s24  ;;  %s139_s8 = scalar_lea.vmem [#allocation5], %s331_s25 }
  0x30   : > { %p658_p7 = pnand %p771_p1, %p770_p0  ;;  %s146_s14 = sshll.u32 %s139_s8, 4  ;;  %s147_s14 = int_to_ptr.vmem [resolvable:$true] %s146_s14 }
  0x31   : > { %s136_s28 = scalar_lea.sflag [#allocation6], %s605_s23  ;;  %s426_s30 = scalar_lea.hbm %s667_s7, 128 }
  0x32   : > { %s772_s29 = scalar_select %p658_p7, 1, 0 }
  0x33   : > { %p427_p11 = scmp.ne.s32.totalorder %s667_s7, %s426_s30  ;;  %s431_s24 = scalar_lea.hbm %s761_s1, 256 }
  0x34   : > { %p432_p2 = scmp.lt.u32.totalorder %s667_s7, %s761_s1  ;;  %p433_p4 = scmp.lt.u32.totalorder %s431_s24, %s426_s30 }
  0x35   : > { %p429_p12 = pnand %p427_p11, %p398_p3  ;;  %p435_p8 = scmp.lt.u32.totalorder %s426_s30, %s667_s7 }
  0x36   : > { %p434_p5 = por %p433_p4, %p432_p2 }
  0x37   : > { %p430_p10 = pneg %p429_p12 }
  0x38   : > { %p436_p9 = por %p435_p8, %p434_p5 }
  0x3a   : > { %p437_p0 = pnand %p436_p9, %p430_p10 }
  0x3c   : > { %440 = shalt.err (!%p437_p0)
}
  0x3d   : > { %s441_s23 = scalar_lea.vmem %s147_s14, 128  ;;  %s529_s25 = smov [#allocation5]  }
  0x3e   : > { %p442_p1 = scmp.ne.s32.totalorder %s147_s14, %s441_s23  ;;  %s446_s26 = sshll.u32 %s529_s25, 4  ;;  %s447_s26 = int_to_ptr.vmem [resolvable:$false] %s446_s26 }
  0x3f   : > { %s448_s27 = scalar_lea.vmem %s447_s26, 256  ;;  %p449_p6 = scmp.lt.s32.totalorder %s147_s14, %s447_s26 }
  0x40   : > { %p444_p11 = pnand %p442_p1, %p398_p3  ;;  %p450_p7 = scmp.lt.s32.totalorder %s448_s27, %s441_s23 }
  0x42   : > { %p445_p12 = pneg %p444_p11  ;;  %p451_p2 = por %p450_p7, %p449_p6 }
  0x44   : > { %p452_p4 = pnand %p451_p2, %p445_p12 }
  0x46   : > { %455 = shalt.err (!%p452_p4)
}
  0x47   : > { %355 = dma.hbm_to_vmem [thread:$0]  (!%p620_p13), %s667_s7, 128, %s147_s14, %s136_s28  }
  0x48   : > { %p773_p10 = scmp.ne.s32.totalorder %s772_s29, 0 }
  0x49   : > { %s694_s5 = sand.u32 (!%p773_p10), 1, %s518_s10   ;;  %p774_p6 = scmp.ne.s32.totalorder (!%p773_p10), %s766_s20, 0 }
  0x4a   : > { %155 = sbr.rel (%p773_p10) target bundleno = 126 (0x7e), region = 28  ;;  %s697_s6 = sshll.u32 (!%p773_p10), %s694_s5, 3 }
  0x4b   : > { %s158_s8 = scalar_lea.sflag (!%p773_p10), [#allocation3], %s694_s5  ;;  %s161_s30 = scalar_lea.vmem (!%p773_p10), [#allocation2], %s697_s6 }
  0x51   : > { %501 = dma.done.wait (%p774_p6), %s158_s8, 128  }
  0x52   : > { %503 = vsyncadd (%p774_p6), %s158_s8, 4294967168  ;;  %s167_s3 = scalar_lea.sflag [#allocation6], %s694_s5  ;;  %s170_s29 = scalar_lea.vmem [#allocation5], %s697_s6 }
  0x53   : > { %505 = dma.done.wait (%p774_p6), %s167_s3, 128  }
  0x54   : > { %507 = vsyncadd (%p774_p6), %s167_s3, 4294967168  ;;  %v196_v0 = vld [vmem:[%s161_s30] sm:$0xff]  ;;  %v197_v1 = vld [vmem:[%s170_s29] sm:$0xff]  ;;  %s195_s20 = scalar_lea.vmem [#allocation7], %s697_s6  ;;  %s340_s14 = sshll.u32 %s567_s13, 7 }
  0x55   : > { %v198_v2 = vsub.f32 %v196_v0, %v197_v1  ;;  %s235_s7 = sshll.u32 %s195_s20, 4  ;;  %s718_s16 = scalar_lea.hbm %s762_s2, %s340_s14  ;;  %s713_s7 = int_to_ptr.vmem [resolvable:$true] %s235_s7 }
  0x56   : > { %s222_s24 = scalar_lea.sflag [#allocation4], %s694_s5  ;;  %s456_s17 = scalar_lea.vmem %s713_s7, 128 }
  0x57   : > { %v199_v3 = vand.u32 2147483647, %v198_v2  ;;  %p457_p13 = scmp.ne.s32.totalorder %s713_s7, %s456_s17  ;;  %p775_p3 = scmp.ne.s32.totalorder %s767_s21, 0 }
  0x58   : > { %s530_s13 = smov [#allocation7]  }
  0x59   : > { %v200_v4 = vmul.f32 19.085537, %v199_v3  ;;  %v215_v12 = vmul.f32 1.5, %v199_v3  ;;  %v213_v14 = vmul.f32 0.5, %v199_v3  ;;  %vm217_vm1 = vcmp.lt.f32.partialorder %v199_v3, 1.0  ;;  %p458_p7 = pnand %p457_p13, %p775_p3  ;;  %s460_s19 = sshll.u32 %s530_s13, 4  ;;  %s461_s19 = int_to_ptr.vmem [resolvable:$false] %s460_s19 }
  0x5a   : > { %s462_s23 = scalar_lea.vmem %s461_s19, 256  ;;  %p463_p8 = scmp.lt.s32.totalorder %s713_s7, %s461_s19 }
  0x5b   : > { %v201_v5 = vadd.f32 1.0, %v200_v4  ;;  %v206_v6 = vmul.f32 -0.5, %v200_v4  ;;  %v209_v8 = vand.u32 2147483647, %v200_v4  ;;  %v216_v17 = vadd.f32 -0.42140645, %v215_v12  ;;  %p459_p5 = pneg %p458_p7  ;;  %p464_p9 = scmp.lt.s32.totalorder %s462_s23, %s456_s17 }
  0x5d   : > { %394 = vlog2.f32 %v201_v5  ;;  %v207_v7 = vadd.f32 1.0, %v206_v6  ;;  %v202_v11 = vmul.f32 0.026197849, %v201_v5  ;;  %vm210_vm0 = vcmp.lt.f32.partialorder %v209_v8, 0.0004427343  ;;  %p465_p0 = por %p464_p9, %p463_p8 }
  0x5f   : > { %v208_v9 = vmul.f32 %v207_v7, %v200_v4  ;;  %p466_p1 = pnand %p465_p0, %p459_p5 }
  0x67   : > { %v395_v10 = vpop.eup %394 }
  0x68   : > { %v205_v13 = vmul.f32 0.6931472, %v395_v10 }
  0x6a   : > { %v211_v15 = vsel %vm210_vm0, %v208_v9, %v205_v13 }
  0x6b   : > { %v212_v16 = vmul.f32 %v211_v15, %v202_v11 }
  0x6d   : > { %v214_v18 = vsub.f32 %v212_v16, %v213_v14 }
  0x6f   : > { %v218_v19 = vsel %vm217_vm1, %v214_v18, %v216_v17 }
  0x70   : > { %220 = vst [vmem:[%s195_s20] sm:$0xff] %v218_v19 }
  0x71   : > { %469 = shalt.err (!%p466_p1)
}
  0x72   : > { %s470_s25 = scalar_lea.hbm %s718_s16, 128  ;;  %s474_s5 = scalar_lea.hbm %s762_s2, 256 }
  0x73   : > { %p471_p11 = scmp.ne.s32.totalorder %s718_s16, %s470_s25  ;;  %p475_p4 = scmp.lt.u32.totalorder %s718_s16, %s762_s2 }
  0x74   : > { %p476_p10 = scmp.lt.u32.totalorder %s474_s5, %s470_s25  ;;  %p478_p13 = scmp.lt.u32.totalorder %s470_s25, %s718_s16 }
  0x75   : > { %p472_p12 = pnand %p471_p11, %p775_p3 }
  0x76   : > { %p477_p6 = por %p476_p10, %p475_p4 }
  0x77   : > { %p473_p2 = pneg %p472_p12 }
  0x78   : > { %p479_p7 = por %p478_p13, %p477_p6 }
  0x7a   : > { %p480_p5 = pnand %p479_p7, %p473_p2 }
  0x7c   : > { %483 = shalt.err (!%p480_p5)
}
  0x7d   : > { %347 = dma.vmem_to_hbm [thread:$0]  (%p775_p3), %s713_s7, 128, %s718_s16, %s222_s24  }
  0x7e PF: > { %s247_s30 = sand.u32 1, %s514_s9   ;;  %p776_p8 = scmp.ne.s32.totalorder %s768_s22, 0 }
  0x7f   : > { %p777_p9 = scmp.ge.s32.totalorder %s526_s12, 2  ;;  %s248_s3 = scalar_lea.sflag [#allocation4], %s247_s30 }
  0x81   : > { %p357_p0 = pnand %p777_p9, %p776_p8 }
  0x83   : > { %509 = dma.done.wait (!%p357_p0), %s248_s3, 128  }
  0x84   : > { %511 = vsyncadd (!%p357_p0), %s248_s3, 4294967168  ;;  %p18_p1 = scmp.ge.s32.totalorder %s571_s15, 4   ;;  %s778_s9 = smov %s518_s10 }
  0x85   : > { %s779_s10 = smov %s522_s11  ;;  %s780_s11 = smov %s583_s18 }
  0x86   : > { %s781_s12 = smov %s571_s15  ;;  %20 = sbr.rel (!%p18_p1) target bundleno = 7 (0x7), region = 86 }
  0x8d   :  { %253 = vsyncpa [#allocation3], 1 }
  0x8e   :  { %255 = vsyncpa [#allocation3 + $0x1], 1 }
  0x8f   :  { %256 = vsyncpa [#allocation6], 1 }
  0x90   :  { %258 = vsyncpa [#allocation6 + $0x1], 1 }
  0x91   :  { %259 = vsyncpa [#allocation4], 1 }
  0x92   :  { %261 = vsyncpa [#allocation4 + $0x1], 1 }

</bundles_post_ra>
